<compile_context>
chip_gen: v6e
topology: v6e:2x2x1
jax: 0.10.0
libtpu: 0.0.40
codegen_flags: <defaults>
</compile_context>

<pallas_src>
import functools

import jax
import jax.numpy as jnp
from jax.experimental import pallas as pl
from jax.experimental.pallas import tpu as pltpu


def upsample_kernel(xs_ref, wt_ref, s_ref, o_ref, *, eps, w_dim):
    """One sample per grid step.

    xs_ref: (1, 3, C_in, (H+2)*W) bf16 — column-shifted (sigma=-1,0,+1), H-padded,
            spatially flattened copies of the input sample.
    wt_ref: (16, C_out, C_in)     bf16 — sub-pixel weight taps,
            index = dy*8 + dx*4 + a*2 + b, tap = W_convT[:, :, 3-dy-2a, 3-dx-2b]^T.
    s_ref:  (1, C_out, 1)         f32  — Dropout2d per-(sample, channel) scale.
    o_ref:  (1, 4, C_out, S)      f32  — phase-separated output, phase = dy*2+dx.
    """
    S = o_ref.shape[-1]
    W = w_dim

    # --- ConvTranspose2d(k=4, s=2, p=1) via sub-pixel decomposition:
    # out[c, 2py+dy, 2px+dx] = sum_{a,b,ic} x[ic, py+dy-1+a, px+dx-1+b]
    #                                       * w[ic, c, 3-dy-2a, 3-dx-2b]
    accs = []
    for ph in range(4):
        dy, dx = ph // 2, ph % 2
        acc = None
        for a in range(2):
            lo = (dy + a) * W                    # row offset rho = dy-1+a (H-padded)
            for b in range(2):
                t = dx + b                       # col offset sigma = dx-1+b (copy idx)
                x_tap = xs_ref[0, t, :, lo:lo + S]           # (C_in, S) bf16
                w_tap = wt_ref[ph * 4 + a * 2 + b]           # (C_out, C_in) bf16
                p = jnp.dot(w_tap, x_tap,
                            preferred_element_type=jnp.float32)
                acc = p if acc is None else acc + p
        accs.append(acc)                                     # (C_out, S) f32
    # (conv bias intentionally omitted: a per-channel constant is exactly
    #  cancelled by the InstanceNorm mean subtraction below.)

    # --- InstanceNorm2d(affine=False): one-pass stats over all 4*S spatial
    # positions (all four phases), f32 accumulators.
    s1 = accs[0].sum(axis=1, keepdims=True)
    s2 = (accs[0] * accs[0]).sum(axis=1, keepdims=True)
    for acc in accs[1:]:
        s1 = s1 + acc.sum(axis=1, keepdims=True)
        s2 = s2 + (acc * acc).sum(axis=1, keepdims=True)
    inv_n = 1.0 / (4.0 * S)
    mean = s1 * inv_n
    var = jnp.maximum(s2 * inv_n - mean * mean, 0.0)
    rstd = jax.lax.rsqrt(var + eps)

    # Fold the (non-negative) Dropout2d channel scale into the norm scale.
    g = rstd * s_ref[0]                  # (C_out, 1)
    shift = mean * g                     # (C_out, 1)

    # --- normalize + ReLU + dropout scale, phase-separated lane-dense stores.
    for ph in range(4):
        y = jnp.maximum(accs[ph] * g - shift, 0.0)
        o_ref[0, ph] = y.astype(o_ref.dtype)


def upsample_forward(x, weight, bias, drop_scale, shortcut=None,
                     *, kernel_size=4, stride=2, padding=1, eps=1e-5):
    """Forward of the CycGan `Upsample` block.

    x:          (N, C_in, H, W)     NCHW float32
    weight:     (C_in, C_out, K, K) PyTorch ConvTranspose2d layout
    bias:       (C_out,)            accepted but unused (cancelled by InstanceNorm)
    drop_scale: (N, C_out)          Dropout2d per-(sample, channel) mask * 1/(1-p)
    shortcut:   optional (N, C_sc, 2H, 2W) concatenated on channels.
    """
    assert (kernel_size, stride, padding) == (4, 2, 1), \
        "sub-pixel path is specialized for k=4, s=2, p=1"
    del bias  # a per-channel constant bias is a no-op before InstanceNorm(affine=False)

    N, C_in, H, W = x.shape
    _, C_out, K, _ = weight.shape
    OH, OW = 2 * H, 2 * W
    S = H * W
    SP = (H + 2) * W

    # --- glue (O(input), bf16): 3 column-shifted, H-padded, flattened copies so
    # every sub-pixel tap is a contiguous (C_in, S) slice inside the kernel.
    xb = x.astype(jnp.bfloat16)
    xw = jnp.pad(xb, ((0, 0), (0, 0), (0, 0), (1, 1)))                     # pad W by 1
    xcols = jnp.stack([xw[..., t:t + W] for t in range(3)], axis=1)        # (N,3,C_in,H,W)
    xcols = jnp.pad(xcols, ((0, 0), (0, 0), (0, 0), (1, 1), (0, 0)))       # pad H by 1
    xcols = xcols.reshape(N, 3, C_in, SP)                                  # (N,3,C_in,(H+2)W)

    # Sub-pixel weight taps: wt[dy*8+dx*4+a*2+b] = weight[:, :, 3-dy-2a, 3-dx-2b]^T.
    w_oc = jnp.transpose(weight, (1, 0, 2, 3))                             # (C_out,C_in,K,K)
    taps = [w_oc[:, :, 3 - dy - 2 * a, 3 - dx - 2 * b]
            for dy in range(2) for dx in range(2)
            for a in range(2) for b in range(2)]
    wt = jnp.stack(taps, axis=0).astype(jnp.bfloat16)                      # (16,C_out,C_in)

    scale = drop_scale.reshape(N, C_out, 1).astype(jnp.float32)

    out_ph = pl.pallas_call(
        functools.partial(upsample_kernel, eps=eps, w_dim=W),
        out_shape=jax.ShapeDtypeStruct((N, 4, C_out, S), jnp.float32),
        grid_spec=pltpu.PrefetchScalarGridSpec(
            num_scalar_prefetch=0,
            grid=(N,),
            in_specs=[
                pl.BlockSpec((1, 3, C_in, SP), lambda n: (n, 0, 0, 0)),
                pl.BlockSpec((16, C_out, C_in), lambda n: (0, 0, 0)),
                pl.BlockSpec((1, C_out, 1), lambda n: (n, 0, 0)),
            ],
            out_specs=pl.BlockSpec((1, 4, C_out, S), lambda n: (n, 0, 0, 0)),
        ),
        compiler_params=pltpu.CompilerParams(
            dimension_semantics=("parallel",),
            vmem_limit_bytes=32 * 1024 * 1024,
        ),
    )(xcols, wt, scale)

    # --- depth-to-space (phase -> interleaved NCHW) + optional concat.
    # TODO(synk): fuse this layout pass + concat into the kernel's stores.
    out = out_ph.reshape(N, 2, 2, C_out, H, W)
    out = out.transpose(0, 3, 4, 1, 5, 2).reshape(N, C_out, OH, OW)
    if shortcut is not None:
        out = jnp.concatenate([out, shortcut], axis=1)   # torch.cat(dim=1)
    return out


def _reference(x, weight, bias, drop_scale, shortcut, eps=1e-5):
    # Pure-JAX reference: ConvTranspose2d via dilated conv with flipped kernel,
    # bias included (it is mathematically cancelled by the InstanceNorm).
    w_flip = jnp.flip(weight, axis=(2, 3)).transpose(1, 0, 2, 3)
    y = jax.lax.conv_general_dilated(
        x, w_flip, window_strides=(1, 1), padding=((2, 2), (2, 2)),
        lhs_dilation=(2, 2), dimension_numbers=('NCHW', 'OIHW', 'NCHW'))
    y = y + bias[None, :, None, None]
    mean = y.mean(axis=(2, 3), keepdims=True)
    var = ((y - mean) ** 2).mean(axis=(2, 3), keepdims=True)
    y = (y - mean) * jax.lax.rsqrt(var + eps)
    y = jnp.maximum(y, 0.0)
    y = y * drop_scale[:, :, None, None]
    if shortcut is not None:
        y = jnp.concatenate([y, shortcut], axis=1)
    return y


if __name__ == "__main__":
    key = jax.random.PRNGKey(0)
    k_x, k_w, k_b, k_d, k_s = jax.random.split(key, 5)

    N, C_in, H, W = 2, 4, 16, 16
    C_out, K = 4, 4
    OH, OW = 2 * H, 2 * W

    x = jax.random.normal(k_x, (N, C_in, H, W), jnp.float32)

    # Deterministic parameter init (ConvTranspose2d weight shape is (in, out, K, K)).
    bound = 1.0 / jnp.sqrt(jnp.float32(C_out * K * K))
    weight = jax.random.uniform(k_w, (C_in, C_out, K, K), jnp.float32, -bound, bound)
    bias = jax.random.uniform(k_b, (C_out,), jnp.float32, -bound, bound)

    # Kernel uses bf16 MXU operands; pre-round x / weight to bf16 values so the
    # f32 reference sees identical inputs and the comparison isolates kernel math.
    x = x.astype(jnp.bfloat16).astype(jnp.float32)
    weight = weight.astype(jnp.bfloat16).astype(jnp.float32)

    # Dropout2d(0.5), training semantics, deterministic via a fixed key:
    # whole channels dropped with prob 0.5, survivors scaled by 1/(1-0.5)=2.
    keep = jax.random.bernoulli(k_d, 0.5, (N, C_out))
    drop_scale = keep.astype(jnp.float32) * 2.0

    shortcut = jax.random.normal(k_s, (N, C_in, OH, OW), jnp.float32)

    out = upsample_forward(x, weight, bias, drop_scale, shortcut)
    out = jax.block_until_ready(out)

    ref = _reference(x, weight, bias, drop_scale, shortcut)
    assert out.shape == (N, C_out + C_in, OH, OW), out.shape
    assert jnp.allclose(out, ref, rtol=1e-3, atol=1e-3), \
        float(jnp.max(jnp.abs(out - ref)))

    print("KERNEL_OK")
</pallas_src>

<mosaic_0001>
module attributes {stable_mosaic.version = 11 : i64} {
  func.func @upsample_kernel(%arg0: i32, %arg1: memref<1x3x4x288xbf16, #tpu.memory_space<vmem>>, %arg2: memref<16x4x4xbf16, #tpu.memory_space<vmem>>, %arg3: memref<1x4x1xf32, #tpu.memory_space<vmem>>, %arg4: memref<1x4x4x256xf32, #tpu.memory_space<vmem>>) attributes {dimension_semantics = [#tpu.dimension_semantics<parallel>], iteration_bounds = array<i64: 2>, scalar_prefetch = 0 : i64, scratch_operands = 0 : i64, tpu.core_type = #tpu.core_type<tc>, window_params = [{transform_indices = @transform_0, window_bounds = array<i64: 1, 3, 4, 288>}, {pipeline_mode = #tpu.pipeline_mode<synchronous>, transform_indices = @transform_1, window_bounds = array<i64: 16, 4, 4>}, {transform_indices = @transform_2, window_bounds = array<i64: 1, 4, 1>}, {transform_indices = @transform_3, window_bounds = array<i64: 1, 4, 4, 256>}]} {
    %c0 = arith.constant 0 : index
    %c0_0 = arith.constant 0 : index
    %c0_1 = arith.constant 0 : index
    %c0_2 = arith.constant 0 : index
    %0 = vector.load %arg1[%c0, %c0_0, %c0_1, %c0_2] : memref<1x3x4x288xbf16, #tpu.memory_space<vmem>>, vector<1x1x4x256xbf16>
    %1 = vector.shape_cast %0 : vector<1x1x4x256xbf16> to vector<4x256xbf16>
    %c0_3 = arith.constant 0 : index
    %c0_4 = arith.constant 0 : index
    %c0_5 = arith.constant 0 : index
    %2 = vector.load %arg2[%c0_3, %c0_4, %c0_5] : memref<16x4x4xbf16, #tpu.memory_space<vmem>>, vector<1x4x4xbf16>
    %3 = vector.shape_cast %2 : vector<1x4x4xbf16> to vector<4x4xbf16>
    %cst = arith.constant dense<0.000000e+00> : vector<4x256xf32>
    %4 = tpu.matmul %3, %1, %cst {dimension_numbers = #tpu.dot_dimension_numbers<[1], [0], [0], [1], [0, 0, 1, 1], [], []>} : vector<4x4xbf16>, vector<4x256xbf16>, vector<4x256xf32> -> vector<4x256xf32>
    %c0_6 = arith.constant 0 : index
    %c1 = arith.constant 1 : index
    %c0_7 = arith.constant 0 : index
    %c0_8 = arith.constant 0 : index
    %5 = vector.load %arg1[%c0_6, %c1, %c0_7, %c0_8] : memref<1x3x4x288xbf16, #tpu.memory_space<vmem>>, vector<1x1x4x256xbf16>
    %6 = vector.shape_cast %5 : vector<1x1x4x256xbf16> to vector<4x256xbf16>
    %c1_9 = arith.constant 1 : index
    %c0_10 = arith.constant 0 : index
    %c0_11 = arith.constant 0 : index
    %7 = vector.load %arg2[%c1_9, %c0_10, %c0_11] : memref<16x4x4xbf16, #tpu.memory_space<vmem>>, vector<1x4x4xbf16>
    %8 = vector.shape_cast %7 : vector<1x4x4xbf16> to vector<4x4xbf16>
    %cst_12 = arith.constant dense<0.000000e+00> : vector<4x256xf32>
    %9 = tpu.matmul %8, %6, %cst_12 {dimension_numbers = #tpu.dot_dimension_numbers<[1], [0], [0], [1], [0, 0, 1, 1], [], []>} : vector<4x4xbf16>, vector<4x256xbf16>, vector<4x256xf32> -> vector<4x256xf32>
    %10 = arith.addf %4, %9 : vector<4x256xf32>
    %c0_13 = arith.constant 0 : index
    %c0_14 = arith.constant 0 : index
    %c0_15 = arith.constant 0 : index
    %c16 = arith.constant 16 : index
    %11 = vector.load %arg1[%c0_13, %c0_14, %c0_15, %c16] : memref<1x3x4x288xbf16, #tpu.memory_space<vmem>>, vector<1x1x4x256xbf16>
    %12 = vector.shape_cast %11 : vector<1x1x4x256xbf16> to vector<4x256xbf16>
    %c2 = arith.constant 2 : index
    %c0_16 = arith.constant 0 : index
    %c0_17 = arith.constant 0 : index
    %13 = vector.load %arg2[%c2, %c0_16, %c0_17] : memref<16x4x4xbf16, #tpu.memory_space<vmem>>, vector<1x4x4xbf16>
    %14 = vector.shape_cast %13 : vector<1x4x4xbf16> to vector<4x4xbf16>
    %cst_18 = arith.constant dense<0.000000e+00> : vector<4x256xf32>
    %15 = tpu.matmul %14, %12, %cst_18 {dimension_numbers = #tpu.dot_dimension_numbers<[1], [0], [0], [1], [0, 0, 1, 1], [], []>} : vector<4x4xbf16>, vector<4x256xbf16>, vector<4x256xf32> -> vector<4x256xf32>
    %16 = arith.addf %10, %15 : vector<4x256xf32>
    %c0_19 = arith.constant 0 : index
    %c1_20 = arith.constant 1 : index
    %c0_21 = arith.constant 0 : index
    %c16_22 = arith.constant 16 : index
    %17 = vector.load %arg1[%c0_19, %c1_20, %c0_21, %c16_22] : memref<1x3x4x288xbf16, #tpu.memory_space<vmem>>, vector<1x1x4x256xbf16>
    %18 = vector.shape_cast %17 : vector<1x1x4x256xbf16> to vector<4x256xbf16>
    %c3 = arith.constant 3 : index
    %c0_23 = arith.constant 0 : index
    %c0_24 = arith.constant 0 : index
    %19 = vector.load %arg2[%c3, %c0_23, %c0_24] : memref<16x4x4xbf16, #tpu.memory_space<vmem>>, vector<1x4x4xbf16>
    %20 = vector.shape_cast %19 : vector<1x4x4xbf16> to vector<4x4xbf16>
    %cst_25 = arith.constant dense<0.000000e+00> : vector<4x256xf32>
    %21 = tpu.matmul %20, %18, %cst_25 {dimension_numbers = #tpu.dot_dimension_numbers<[1], [0], [0], [1], [0, 0, 1, 1], [], []>} : vector<4x4xbf16>, vector<4x256xbf16>, vector<4x256xf32> -> vector<4x256xf32>
    %22 = arith.addf %16, %21 : vector<4x256xf32>
    %c0_26 = arith.constant 0 : index
    %c1_27 = arith.constant 1 : index
    %c0_28 = arith.constant 0 : index
    %c0_29 = arith.constant 0 : index
    %23 = vector.load %arg1[%c0_26, %c1_27, %c0_28, %c0_29] : memref<1x3x4x288xbf16, #tpu.memory_space<vmem>>, vector<1x1x4x256xbf16>
    %24 = vector.shape_cast %23 : vector<1x1x4x256xbf16> to vector<4x256xbf16>
    %c4 = arith.constant 4 : index
    %c0_30 = arith.constant 0 : index
    %c0_31 = arith.constant 0 : index
    %25 = vector.load %arg2[%c4, %c0_30, %c0_31] : memref<16x4x4xbf16, #tpu.memory_space<vmem>>, vector<1x4x4xbf16>
    %26 = vector.shape_cast %25 : vector<1x4x4xbf16> to vector<4x4xbf16>
    %cst_32 = arith.constant dense<0.000000e+00> : vector<4x256xf32>
    %27 = tpu.matmul %26, %24, %cst_32 {dimension_numbers = #tpu.dot_dimension_numbers<[1], [0], [0], [1], [0, 0, 1, 1], [], []>} : vector<4x4xbf16>, vector<4x256xbf16>, vector<4x256xf32> -> vector<4x256xf32>
    %c0_33 = arith.constant 0 : index
    %c2_34 = arith.constant 2 : index
    %c0_35 = arith.constant 0 : index
    %c0_36 = arith.constant 0 : index
    %28 = vector.load %arg1[%c0_33, %c2_34, %c0_35, %c0_36] : memref<1x3x4x288xbf16, #tpu.memory_space<vmem>>, vector<1x1x4x256xbf16>
    %29 = vector.shape_cast %28 : vector<1x1x4x256xbf16> to vector<4x256xbf16>
    %c5 = arith.constant 5 : index
    %c0_37 = arith.constant 0 : index
    %c0_38 = arith.constant 0 : index
    %30 = vector.load %arg2[%c5, %c0_37, %c0_38] : memref<16x4x4xbf16, #tpu.memory_space<vmem>>, vector<1x4x4xbf16>
    %31 = vector.shape_cast %30 : vector<1x4x4xbf16> to vector<4x4xbf16>
    %cst_39 = arith.constant dense<0.000000e+00> : vector<4x256xf32>
    %32 = tpu.matmul %31, %29, %cst_39 {dimension_numbers = #tpu.dot_dimension_numbers<[1], [0], [0], [1], [0, 0, 1, 1], [], []>} : vector<4x4xbf16>, vector<4x256xbf16>, vector<4x256xf32> -> vector<4x256xf32>
    %33 = arith.addf %27, %32 : vector<4x256xf32>
    %c0_40 = arith.constant 0 : index
    %c1_41 = arith.constant 1 : index
    %c0_42 = arith.constant 0 : index
    %c16_43 = arith.constant 16 : index
    %34 = vector.load %arg1[%c0_40, %c1_41, %c0_42, %c16_43] : memref<1x3x4x288xbf16, #tpu.memory_space<vmem>>, vector<1x1x4x256xbf16>
    %35 = vector.shape_cast %34 : vector<1x1x4x256xbf16> to vector<4x256xbf16>
    %c6 = arith.constant 6 : index
    %c0_44 = arith.constant 0 : index
    %c0_45 = arith.constant 0 : index
    %36 = vector.load %arg2[%c6, %c0_44, %c0_45] : memref<16x4x4xbf16, #tpu.memory_space<vmem>>, vector<1x4x4xbf16>
    %37 = vector.shape_cast %36 : vector<1x4x4xbf16> to vector<4x4xbf16>
    %cst_46 = arith.constant dense<0.000000e+00> : vector<4x256xf32>
    %38 = tpu.matmul %37, %35, %cst_46 {dimension_numbers = #tpu.dot_dimension_numbers<[1], [0], [0], [1], [0, 0, 1, 1], [], []>} : vector<4x4xbf16>, vector<4x256xbf16>, vector<4x256xf32> -> vector<4x256xf32>
    %39 = arith.addf %33, %38 : vector<4x256xf32>
    %c0_47 = arith.constant 0 : index
    %c2_48 = arith.constant 2 : index
    %c0_49 = arith.constant 0 : index
    %c16_50 = arith.constant 16 : index
    %40 = vector.load %arg1[%c0_47, %c2_48, %c0_49, %c16_50] : memref<1x3x4x288xbf16, #tpu.memory_space<vmem>>, vector<1x1x4x256xbf16>
    %41 = vector.shape_cast %40 : vector<1x1x4x256xbf16> to vector<4x256xbf16>
    %c7 = arith.constant 7 : index
    %c0_51 = arith.constant 0 : index
    %c0_52 = arith.constant 0 : index
    %42 = vector.load %arg2[%c7, %c0_51, %c0_52] : memref<16x4x4xbf16, #tpu.memory_space<vmem>>, vector<1x4x4xbf16>
    %43 = vector.shape_cast %42 : vector<1x4x4xbf16> to vector<4x4xbf16>
    %cst_53 = arith.constant dense<0.000000e+00> : vector<4x256xf32>
    %44 = tpu.matmul %43, %41, %cst_53 {dimension_numbers = #tpu.dot_dimension_numbers<[1], [0], [0], [1], [0, 0, 1, 1], [], []>} : vector<4x4xbf16>, vector<4x256xbf16>, vector<4x256xf32> -> vector<4x256xf32>
    %45 = arith.addf %39, %44 : vector<4x256xf32>
    %c0_54 = arith.constant 0 : index
    %c0_55 = arith.constant 0 : index
    %c0_56 = arith.constant 0 : index
    %c16_57 = arith.constant 16 : index
    %46 = vector.load %arg1[%c0_54, %c0_55, %c0_56, %c16_57] : memref<1x3x4x288xbf16, #tpu.memory_space<vmem>>, vector<1x1x4x256xbf16>
    %47 = vector.shape_cast %46 : vector<1x1x4x256xbf16> to vector<4x256xbf16>
    %c8 = arith.constant 8 : index
    %c0_58 = arith.constant 0 : index
    %c0_59 = arith.constant 0 : index
    %48 = vector.load %arg2[%c8, %c0_58, %c0_59] : memref<16x4x4xbf16, #tpu.memory_space<vmem>>, vector<1x4x4xbf16>
    %49 = vector.shape_cast %48 : vector<1x4x4xbf16> to vector<4x4xbf16>
    %cst_60 = arith.constant dense<0.000000e+00> : vector<4x256xf32>
    %50 = tpu.matmul %49, %47, %cst_60 {dimension_numbers = #tpu.dot_dimension_numbers<[1], [0], [0], [1], [0, 0, 1, 1], [], []>} : vector<4x4xbf16>, vector<4x256xbf16>, vector<4x256xf32> -> vector<4x256xf32>
    %c0_61 = arith.constant 0 : index
    %c1_62 = arith.constant 1 : index
    %c0_63 = arith.constant 0 : index
    %c16_64 = arith.constant 16 : index
    %51 = vector.load %arg1[%c0_61, %c1_62, %c0_63, %c16_64] : memref<1x3x4x288xbf16, #tpu.memory_space<vmem>>, vector<1x1x4x256xbf16>
    %52 = vector.shape_cast %51 : vector<1x1x4x256xbf16> to vector<4x256xbf16>
    %c9 = arith.constant 9 : index
    %c0_65 = arith.constant 0 : index
    %c0_66 = arith.constant 0 : index
    %53 = vector.load %arg2[%c9, %c0_65, %c0_66] : memref<16x4x4xbf16, #tpu.memory_space<vmem>>, vector<1x4x4xbf16>
    %54 = vector.shape_cast %53 : vector<1x4x4xbf16> to vector<4x4xbf16>
    %cst_67 = arith.constant dense<0.000000e+00> : vector<4x256xf32>
    %55 = tpu.matmul %54, %52, %cst_67 {dimension_numbers = #tpu.dot_dimension_numbers<[1], [0], [0], [1], [0, 0, 1, 1], [], []>} : vector<4x4xbf16>, vector<4x256xbf16>, vector<4x256xf32> -> vector<4x256xf32>
    %56 = arith.addf %50, %55 : vector<4x256xf32>
    %c0_68 = arith.constant 0 : index
    %c0_69 = arith.constant 0 : index
    %c0_70 = arith.constant 0 : index
    %c32 = arith.constant 32 : index
    %57 = vector.load %arg1[%c0_68, %c0_69, %c0_70, %c32] : memref<1x3x4x288xbf16, #tpu.memory_space<vmem>>, vector<1x1x4x256xbf16>
    %58 = vector.shape_cast %57 : vector<1x1x4x256xbf16> to vector<4x256xbf16>
    %c10 = arith.constant 10 : index
    %c0_71 = arith.constant 0 : index
    %c0_72 = arith.constant 0 : index
    %59 = vector.load %arg2[%c10, %c0_71, %c0_72] : memref<16x4x4xbf16, #tpu.memory_space<vmem>>, vector<1x4x4xbf16>
    %60 = vector.shape_cast %59 : vector<1x4x4xbf16> to vector<4x4xbf16>
    %cst_73 = arith.constant dense<0.000000e+00> : vector<4x256xf32>
    %61 = tpu.matmul %60, %58, %cst_73 {dimension_numbers = #tpu.dot_dimension_numbers<[1], [0], [0], [1], [0, 0, 1, 1], [], []>} : vector<4x4xbf16>, vector<4x256xbf16>, vector<4x256xf32> -> vector<4x256xf32>
    %62 = arith.addf %56, %61 : vector<4x256xf32>
    %c0_74 = arith.constant 0 : index
    %c1_75 = arith.constant 1 : index
    %c0_76 = arith.constant 0 : index
    %c32_77 = arith.constant 32 : index
    %63 = vector.load %arg1[%c0_74, %c1_75, %c0_76, %c32_77] : memref<1x3x4x288xbf16, #tpu.memory_space<vmem>>, vector<1x1x4x256xbf16>
    %64 = vector.shape_cast %63 : vector<1x1x4x256xbf16> to vector<4x256xbf16>
    %c11 = arith.constant 11 : index
    %c0_78 = arith.constant 0 : index
    %c0_79 = arith.constant 0 : index
    %65 = vector.load %arg2[%c11, %c0_78, %c0_79] : memref<16x4x4xbf16, #tpu.memory_space<vmem>>, vector<1x4x4xbf16>
    %66 = vector.shape_cast %65 : vector<1x4x4xbf16> to vector<4x4xbf16>
    %cst_80 = arith.constant dense<0.000000e+00> : vector<4x256xf32>
    %67 = tpu.matmul %66, %64, %cst_80 {dimension_numbers = #tpu.dot_dimension_numbers<[1], [0], [0], [1], [0, 0, 1, 1], [], []>} : vector<4x4xbf16>, vector<4x256xbf16>, vector<4x256xf32> -> vector<4x256xf32>
    %68 = arith.addf %62, %67 : vector<4x256xf32>
    %c0_81 = arith.constant 0 : index
    %c1_82 = arith.constant 1 : index
    %c0_83 = arith.constant 0 : index
    %c16_84 = arith.constant 16 : index
    %69 = vector.load %arg1[%c0_81, %c1_82, %c0_83, %c16_84] : memref<1x3x4x288xbf16, #tpu.memory_space<vmem>>, vector<1x1x4x256xbf16>
    %70 = vector.shape_cast %69 : vector<1x1x4x256xbf16> to vector<4x256xbf16>
    %c12 = arith.constant 12 : index
    %c0_85 = arith.constant 0 : index
    %c0_86 = arith.constant 0 : index
    %71 = vector.load %arg2[%c12, %c0_85, %c0_86] : memref<16x4x4xbf16, #tpu.memory_space<vmem>>, vector<1x4x4xbf16>
    %72 = vector.shape_cast %71 : vector<1x4x4xbf16> to vector<4x4xbf16>
    %cst_87 = arith.constant dense<0.000000e+00> : vector<4x256xf32>
    %73 = tpu.matmul %72, %70, %cst_87 {dimension_numbers = #tpu.dot_dimension_numbers<[1], [0], [0], [1], [0, 0, 1, 1], [], []>} : vector<4x4xbf16>, vector<4x256xbf16>, vector<4x256xf32> -> vector<4x256xf32>
    %c0_88 = arith.constant 0 : index
    %c2_89 = arith.constant 2 : index
    %c0_90 = arith.constant 0 : index
    %c16_91 = arith.constant 16 : index
    %74 = vector.load %arg1[%c0_88, %c2_89, %c0_90, %c16_91] : memref<1x3x4x288xbf16, #tpu.memory_space<vmem>>, vector<1x1x4x256xbf16>
    %75 = vector.shape_cast %74 : vector<1x1x4x256xbf16> to vector<4x256xbf16>
    %c13 = arith.constant 13 : index
    %c0_92 = arith.constant 0 : index
    %c0_93 = arith.constant 0 : index
    %76 = vector.load %arg2[%c13, %c0_92, %c0_93] : memref<16x4x4xbf16, #tpu.memory_space<vmem>>, vector<1x4x4xbf16>
    %77 = vector.shape_cast %76 : vector<1x4x4xbf16> to vector<4x4xbf16>
    %cst_94 = arith.constant dense<0.000000e+00> : vector<4x256xf32>
    %78 = tpu.matmul %77, %75, %cst_94 {dimension_numbers = #tpu.dot_dimension_numbers<[1], [0], [0], [1], [0, 0, 1, 1], [], []>} : vector<4x4xbf16>, vector<4x256xbf16>, vector<4x256xf32> -> vector<4x256xf32>
    %79 = arith.addf %73, %78 : vector<4x256xf32>
    %c0_95 = arith.constant 0 : index
    %c1_96 = arith.constant 1 : index
    %c0_97 = arith.constant 0 : index
    %c32_98 = arith.constant 32 : index
    %80 = vector.load %arg1[%c0_95, %c1_96, %c0_97, %c32_98] : memref<1x3x4x288xbf16, #tpu.memory_space<vmem>>, vector<1x1x4x256xbf16>
    %81 = vector.shape_cast %80 : vector<1x1x4x256xbf16> to vector<4x256xbf16>
    %c14 = arith.constant 14 : index
    %c0_99 = arith.constant 0 : index
    %c0_100 = arith.constant 0 : index
    %82 = vector.load %arg2[%c14, %c0_99, %c0_100] : memref<16x4x4xbf16, #tpu.memory_space<vmem>>, vector<1x4x4xbf16>
    %83 = vector.shape_cast %82 : vector<1x4x4xbf16> to vector<4x4xbf16>
    %cst_101 = arith.constant dense<0.000000e+00> : vector<4x256xf32>
    %84 = tpu.matmul %83, %81, %cst_101 {dimension_numbers = #tpu.dot_dimension_numbers<[1], [0], [0], [1], [0, 0, 1, 1], [], []>} : vector<4x4xbf16>, vector<4x256xbf16>, vector<4x256xf32> -> vector<4x256xf32>
    %85 = arith.addf %79, %84 : vector<4x256xf32>
    %c0_102 = arith.constant 0 : index
    %c2_103 = arith.constant 2 : index
    %c0_104 = arith.constant 0 : index
    %c32_105 = arith.constant 32 : index
    %86 = vector.load %arg1[%c0_102, %c2_103, %c0_104, %c32_105] : memref<1x3x4x288xbf16, #tpu.memory_space<vmem>>, vector<1x1x4x256xbf16>
    %87 = vector.shape_cast %86 : vector<1x1x4x256xbf16> to vector<4x256xbf16>
    %c15 = arith.constant 15 : index
    %c0_106 = arith.constant 0 : index
    %c0_107 = arith.constant 0 : index
    %88 = vector.load %arg2[%c15, %c0_106, %c0_107] : memref<16x4x4xbf16, #tpu.memory_space<vmem>>, vector<1x4x4xbf16>
    %89 = vector.shape_cast %88 : vector<1x4x4xbf16> to vector<4x4xbf16>
    %cst_108 = arith.constant dense<0.000000e+00> : vector<4x256xf32>
    %90 = tpu.matmul %89, %87, %cst_108 {dimension_numbers = #tpu.dot_dimension_numbers<[1], [0], [0], [1], [0, 0, 1, 1], [], []>} : vector<4x4xbf16>, vector<4x256xbf16>, vector<4x256xf32> -> vector<4x256xf32>
    %91 = arith.addf %85, %90 : vector<4x256xf32>
    %cst_109 = arith.constant dense<0.000000e+00> : vector<4xf32>
    %92 = vector.multi_reduction <add>, %22, %cst_109 [1] : vector<4x256xf32> to vector<4xf32>
    %93 = vector.shape_cast %92 : vector<4xf32> to vector<4x1xf32>
    %94 = arith.mulf %22, %22 : vector<4x256xf32>
    %cst_110 = arith.constant dense<0.000000e+00> : vector<4xf32>
    %95 = vector.multi_reduction <add>, %94, %cst_110 [1] : vector<4x256xf32> to vector<4xf32>
    %96 = vector.shape_cast %95 : vector<4xf32> to vector<4x1xf32>
    %cst_111 = arith.constant dense<0.000000e+00> : vector<4xf32>
    %97 = vector.multi_reduction <add>, %45, %cst_111 [1] : vector<4x256xf32> to vector<4xf32>
    %98 = vector.shape_cast %97 : vector<4xf32> to vector<4x1xf32>
    %99 = arith.addf %93, %98 : vector<4x1xf32>
    %100 = arith.mulf %45, %45 : vector<4x256xf32>
    %cst_112 = arith.constant dense<0.000000e+00> : vector<4xf32>
    %101 = vector.multi_reduction <add>, %100, %cst_112 [1] : vector<4x256xf32> to vector<4xf32>
    %102 = vector.shape_cast %101 : vector<4xf32> to vector<4x1xf32>
    %103 = arith.addf %96, %102 : vector<4x1xf32>
    %cst_113 = arith.constant dense<0.000000e+00> : vector<4xf32>
    %104 = vector.multi_reduction <add>, %68, %cst_113 [1] : vector<4x256xf32> to vector<4xf32>
    %105 = vector.shape_cast %104 : vector<4xf32> to vector<4x1xf32>
    %106 = arith.addf %99, %105 : vector<4x1xf32>
    %107 = arith.mulf %68, %68 : vector<4x256xf32>
    %cst_114 = arith.constant dense<0.000000e+00> : vector<4xf32>
    %108 = vector.multi_reduction <add>, %107, %cst_114 [1] : vector<4x256xf32> to vector<4xf32>
    %109 = vector.shape_cast %108 : vector<4xf32> to vector<4x1xf32>
    %110 = arith.addf %103, %109 : vector<4x1xf32>
    %cst_115 = arith.constant dense<0.000000e+00> : vector<4xf32>
    %111 = vector.multi_reduction <add>, %91, %cst_115 [1] : vector<4x256xf32> to vector<4xf32>
    %112 = vector.shape_cast %111 : vector<4xf32> to vector<4x1xf32>
    %113 = arith.addf %106, %112 : vector<4x1xf32>
    %114 = arith.mulf %91, %91 : vector<4x256xf32>
    %cst_116 = arith.constant dense<0.000000e+00> : vector<4xf32>
    %115 = vector.multi_reduction <add>, %114, %cst_116 [1] : vector<4x256xf32> to vector<4xf32>
    %116 = vector.shape_cast %115 : vector<4xf32> to vector<4x1xf32>
    %117 = arith.addf %110, %116 : vector<4x1xf32>
    %cst_117 = arith.constant 9.765625E-4 : f32
    %118 = vector.broadcast %cst_117 : f32 to vector<4x1xf32>
    %119 = arith.mulf %113, %118 : vector<4x1xf32>
    %cst_118 = arith.constant 9.765625E-4 : f32
    %120 = vector.broadcast %cst_118 : f32 to vector<4x1xf32>
    %121 = arith.mulf %117, %120 : vector<4x1xf32>
    %122 = arith.mulf %119, %119 : vector<4x1xf32>
    %123 = arith.subf %121, %122 : vector<4x1xf32>
    %cst_119 = arith.constant 0.000000e+00 : f32
    %124 = vector.broadcast %cst_119 : f32 to vector<4x1xf32>
    %125 = arith.maximumf %123, %124 : vector<4x1xf32>
    %cst_120 = arith.constant 9.99999974E-6 : f32
    %126 = vector.broadcast %cst_120 : f32 to vector<4x1xf32>
    %127 = arith.addf %125, %126 : vector<4x1xf32>
    %128 = math.rsqrt %127 : vector<4x1xf32>
    %c0_121 = arith.constant 0 : index
    %c0_122 = arith.constant 0 : index
    %c0_123 = arith.constant 0 : index
    %129 = vector.load %arg3[%c0_121, %c0_122, %c0_123] : memref<1x4x1xf32, #tpu.memory_space<vmem>>, vector<1x4x1xf32>
    %130 = vector.shape_cast %129 : vector<1x4x1xf32> to vector<4x1xf32>
    %131 = arith.mulf %128, %130 : vector<4x1xf32>
    %132 = arith.mulf %119, %131 : vector<4x1xf32>
    %133 = vector.broadcast %131 : vector<4x1xf32> to vector<4x256xf32>
    %134 = arith.mulf %22, %133 : vector<4x256xf32>
    %135 = vector.broadcast %132 : vector<4x1xf32> to vector<4x256xf32>
    %136 = arith.subf %134, %135 : vector<4x256xf32>
    %cst_124 = arith.constant 0.000000e+00 : f32
    %137 = vector.broadcast %cst_124 : f32 to vector<4x256xf32>
    %138 = arith.maximumf %136, %137 : vector<4x256xf32>
    %c0_125 = arith.constant 0 : index
    %c0_126 = arith.constant 0 : index
    %c0_127 = arith.constant 0 : index
    %c0_128 = arith.constant 0 : index
    %139 = vector.load %arg4[%c0_125, %c0_126, %c0_127, %c0_128] : memref<1x4x4x256xf32, #tpu.memory_space<vmem>>, vector<1x1x4x256xf32>
    %140 = vector.shape_cast %139 : vector<1x1x4x256xf32> to vector<4x256xf32>
    %141 = vector.shape_cast %138 : vector<4x256xf32> to vector<1x1x4x256xf32>
    tpu.vector_store %arg4[%c0_125, %c0_126, %c0_127, %c0_128], %141 {strides = array<i32>} : memref<1x4x4x256xf32, #tpu.memory_space<vmem>>, vector<1x1x4x256xf32>,
    %142 = vector.broadcast %131 : vector<4x1xf32> to vector<4x256xf32>
    %143 = arith.mulf %45, %142 : vector<4x256xf32>
    %144 = vector.broadcast %132 : vector<4x1xf32> to vector<4x256xf32>
    %145 = arith.subf %143, %144 : vector<4x256xf32>
    %cst_129 = arith.constant 0.000000e+00 : f32
    %146 = vector.broadcast %cst_129 : f32 to vector<4x256xf32>
    %147 = arith.maximumf %145, %146 : vector<4x256xf32>
    %c0_130 = arith.constant 0 : index
    %c1_131 = arith.constant 1 : index
    %c0_132 = arith.constant 0 : index
    %c0_133 = arith.constant 0 : index
    %148 = vector.load %arg4[%c0_130, %c1_131, %c0_132, %c0_133] : memref<1x4x4x256xf32, #tpu.memory_space<vmem>>, vector<1x1x4x256xf32>
    %149 = vector.shape_cast %148 : vector<1x1x4x256xf32> to vector<4x256xf32>
    %150 = vector.shape_cast %147 : vector<4x256xf32> to vector<1x1x4x256xf32>
    tpu.vector_store %arg4[%c0_130, %c1_131, %c0_132, %c0_133], %150 {strides = array<i32>} : memref<1x4x4x256xf32, #tpu.memory_space<vmem>>, vector<1x1x4x256xf32>,
    %151 = vector.broadcast %131 : vector<4x1xf32> to vector<4x256xf32>
    %152 = arith.mulf %68, %151 : vector<4x256xf32>
    %153 = vector.broadcast %132 : vector<4x1xf32> to vector<4x256xf32>
    %154 = arith.subf %152, %153 : vector<4x256xf32>
    %cst_134 = arith.constant 0.000000e+00 : f32
    %155 = vector.broadcast %cst_134 : f32 to vector<4x256xf32>
    %156 = arith.maximumf %154, %155 : vector<4x256xf32>
    %c0_135 = arith.constant 0 : index
    %c2_136 = arith.constant 2 : index
    %c0_137 = arith.constant 0 : index
    %c0_138 = arith.constant 0 : index
    %157 = vector.load %arg4[%c0_135, %c2_136, %c0_137, %c0_138] : memref<1x4x4x256xf32, #tpu.memory_space<vmem>>, vector<1x1x4x256xf32>
    %158 = vector.shape_cast %157 : vector<1x1x4x256xf32> to vector<4x256xf32>
    %159 = vector.shape_cast %156 : vector<4x256xf32> to vector<1x1x4x256xf32>
    tpu.vector_store %arg4[%c0_135, %c2_136, %c0_137, %c0_138], %159 {strides = array<i32>} : memref<1x4x4x256xf32, #tpu.memory_space<vmem>>, vector<1x1x4x256xf32>,
    %160 = vector.broadcast %131 : vector<4x1xf32> to vector<4x256xf32>
    %161 = arith.mulf %91, %160 : vector<4x256xf32>
    %162 = vector.broadcast %132 : vector<4x1xf32> to vector<4x256xf32>
    %163 = arith.subf %161, %162 : vector<4x256xf32>
    %cst_139 = arith.constant 0.000000e+00 : f32
    %164 = vector.broadcast %cst_139 : f32 to vector<4x256xf32>
    %165 = arith.maximumf %163, %164 : vector<4x256xf32>
    %c0_140 = arith.constant 0 : index
    %c3_141 = arith.constant 3 : index
    %c0_142 = arith.constant 0 : index
    %c0_143 = arith.constant 0 : index
    %166 = vector.load %arg4[%c0_140, %c3_141, %c0_142, %c0_143] : memref<1x4x4x256xf32, #tpu.memory_space<vmem>>, vector<1x1x4x256xf32>
    %167 = vector.shape_cast %166 : vector<1x1x4x256xf32> to vector<4x256xf32>
    %168 = vector.shape_cast %165 : vector<4x256xf32> to vector<1x1x4x256xf32>
    tpu.vector_store %arg4[%c0_140, %c3_141, %c0_142, %c0_143], %168 {strides = array<i32>} : memref<1x4x4x256xf32, #tpu.memory_space<vmem>>, vector<1x1x4x256xf32>,
    return
  }
  func.func @transform_0(%arg0: i32) -> (i32, i32, i32, i32) {
    %c0_i32 = arith.constant 0 : i32
    %c0_i32_0 = arith.constant 0 : i32
    %c0_i32_1 = arith.constant 0 : i32
    %c0_i32_2 = arith.constant 0 : i32
    return %arg0, %c0_i32, %c0_i32_0, %c0_i32_1 : i32, i32, i32, i32
  }
  func.func @transform_1(%arg0: i32) -> (i32, i32, i32) {
    %c0_i32 = arith.constant 0 : i32
    %c0_i32_0 = arith.constant 0 : i32
    %c0_i32_1 = arith.constant 0 : i32
    %c0_i32_2 = arith.constant 0 : i32
    return %c0_i32, %c0_i32_0, %c0_i32_1 : i32, i32, i32
  }
  func.func @transform_2(%arg0: i32) -> (i32, i32, i32) {
    %c0_i32 = arith.constant 0 : i32
    %c0_i32_0 = arith.constant 0 : i32
    %c0_i32_1 = arith.constant 0 : i32
    return %arg0, %c0_i32, %c0_i32_0 : i32, i32, i32
  }
  func.func @transform_3(%arg0: i32) -> (i32, i32, i32, i32) {
    %c0_i32 = arith.constant 0 : i32
    %c0_i32_0 = arith.constant 0 : i32
    %c0_i32_1 = arith.constant 0 : i32
    %c0_i32_2 = arith.constant 0 : i32
    return %arg0, %c0_i32, %c0_i32_0, %c0_i32_1 : i32, i32, i32, i32
  }
}

</mosaic_0001>

<bundles_post_ra>
// kernel: tpu_custom_call.1
= control target key start
LH: loop header
LB: loop body
LE: loop exit
PB: predicated region body
PF: predicated region fallthrough
CT: control target
= control target key end

     0   :  { %8 = vsyncpa [#allocation3], 0  ;;  %s1949_s0 = inlined_call_operand.vmem [shape: bf16[2,3,4,288], index: 0, kind: input, shape index: {}]   ;;  %s1950_s1 = inlined_call_operand.vmem [shape: bf16[16,4,4], index: 1, kind: input, shape index: {}]   ;;  %s1951_s2 = inlined_call_operand.vmem [shape: f32[2,4,1], index: 2, kind: input, shape index: {}]   ;;  %s1952_s3 = inlined_call_operand.hbm [shape: f32[2,4,4,256], index: 3, kind: output, shape index: {}]  }
   0x1   :  { %10 = vsyncpa [#allocation3 + $0x1], 0  ;;  %s1611_s12 = smov 0   ;;  %s1613_s13 = smov 0  }
   0x2   :  { %s1615_s14 = smov 0   ;;  %s1617_s15 = smov 0  }
   0x3 LB: > { %s1632_s16 = sadd.s32 4294967295, %s1582_s15   ;;  %s1394_s17 = sadd.s32 4294967294, %s1582_s15   ;;  %s1582_s15 = sphi %s1617_s15, %s1958_s15   ;;  %s1578_s14 = sphi %s1615_s14, %s1957_s14   ;;  %s1574_s13 = sphi %s1613_s13, %s1956_s13   ;;  %s1570_s12 = sphi %s1611_s12, %s1955_s12  }
   0x4   : > { %s1636_s18 = sadd.s32 1, %s1582_s15   ;;  %s96_s19 = sadd.s32 1, %s1578_s14 }
   0x5   : > { %s93_s20 = ssub.s32 %s1582_s15, %s1636_s18  ;;  %p106_p0 = scmp.ne.s32.totalorder %s1578_s14, %s1574_s13 }
   0x6   : > { %p94_p1 = scmp.eq.s32.totalorder %s93_s20, 0  ;;  %p107_p2 = scmp.eq.s32.totalorder %s1632_s16, 1 }
   0x7   : > { %p112_p3 = scmp.ne.s32.totalorder %s1574_s13, %s1570_s12  ;;  %p113_p4 = scmp.eq.s32.totalorder %s1394_s17, 1 }
   0x8   : > { %s1647_s21 = scalar_select %p94_p1, %s1578_s14, %s96_s19  }
   0x9   : > { %p1649_p5 = por %p107_p2, %p106_p0  ;;  %p1653_p6 = por %p113_p4, %p112_p3 }
   0xa   : > { %p1397_p7 = scmp.ge.s32.totalorder %s1582_s15, 1  ;;  %p149_p8 = scmp.lt.s32.totalorder %s1582_s15, 3 }
   0xc   : > { %p150_p9 = pnand %p1397_p7, %p149_p8 }
   0xd   : > { %p177_p10 = scmp.lt.s32.totalorder (!%p150_p9), %s1632_s16, 1  ;;  %s1586_s29 = smov (!%p150_p9), 112  }
   0xe   : > { %153 = sbr.rel (%p150_p9) target bundleno = 717 (0x2cd), region = 32  ;;  %s1587_s7 = smov (!%p150_p9), 96  }
   0xf   : > { %s174_s6 = sand.u32 (!%p150_p9), 1, %s1574_s13   ;;  %s1588_s20 = smov (!%p150_p9), [#allocation2]  }
  0x13   : > { %v321_v0 = vlaneseq  ;;  %v1584_v1 = vmov 1983009808   ;;  %v1585_v3 = vmov 0   ;;  %s1663_s24 = scalar_select %p177_p10, %s1632_s16, 1  ;;  %vm206_vm0 = vcmask 1041408  }
  0x14   : > { %v319_v2 = vunpack.c.l.s4 %v1584_v1  ;;  %245 = vmatprep.mubr.bf16.mxu0 %v1585_v3  ;;  %304 = vmatprep.mubr.bf16.mxu1 %v1585_v3  ;;  %v1402_v25 = vld [vmem:[%s1950_s1 + $0x2] sm:$0x3]  ;;  %vm202_vm1 = vcmask 31744   ;;  %v188_v26 = vld [vmem:[%s1950_s1] sm:$0x3]  ;;  %vm339_vm2 = vcmask 916480  }
  0x15   : > { %v322_v4 = vshrl.u32 %v321_v0, 7  ;;  %1512 = vset.pattern.permute.xlu1 %v1585_v3  ;;  %1513 = vset.pattern.permute.xlu0 %v1585_v3  ;;  %s1466_s25 = smul.u32 18, %s1663_s24  ;;  %v1409_v54 = vld [vmem:[%s1950_s1 + $0x4] sm:$0x3]  ;;  %v1413_v61 = vld [vmem:[%s1950_s1 + $0x6] sm:$0x3] }
  0x16   : > { %v320_v5 = vunpack.c.0.s8 %v319_v2  ;;  %v1418_v0 = vld [vmem:[%s1950_s1 + $0xa] sm:$0x3]  ;;  %vm829_vm3 = vcmask 785408   ;;  %vm1184_vm4 = vcmask 1043456  }
  0x17   : > { %s1673_s28 = scalar_lea.vmem %s1949_s0, %s1466_s25  ;;  %s1526_s25 = sshll.u32 %s1588_s20, 4  ;;  %s1527_s25 = int_to_ptr.vmem [resolvable:$false] %s1526_s25 }
  0x18   : > { %v1668_v6 = vsub.s32 %v320_v5, %v322_v4  ;;  %v1412_v7 = vld [vmem:[%s1673_s28 + $0x6] sm:$0x3f]  ;;  %v313_v8 = vld [vmem:[%s1673_s28] sm:$0x3f]  ;;  %v1427_v17 = vld [vmem:[%s1673_s28 + $0xc] sm:$0x3f] }
  0x19   : > { %v317_v11 = vcombine.high %v313_v8, %v313_v8  ;;  %v1403_v12 = vld.sshfl [vmem:[%s1673_s28 + $0x6] sm:$0x33 pattern:$0x76325410]  ;;  %v398_v13 = vcombine.high %v1412_v7, %v1412_v7  ;;  %v635_v27 = vcombine.high %v1427_v17, %v1427_v17  ;;  %v803_v29 = vld [vmem:[%s1673_s28] sm:$0x3f] }
  0x1a   : > { %v405_v9 = vrot.slane %v1412_v7, %v1668_v6  ;;  %v324_v10 = vrot.slane %v313_v8, %v1668_v6  ;;  %v1406_v16 = vld.sshfl [vmem:[%s1673_s28] sm:$0x33 pattern:$0x76325410]  ;;  %v1685_v18 = vcombine.high %v1403_v12, %v1403_v12  ;;  %v1688_v19 = vsel %vm206_vm0, %v1403_v12, 0  ;;  %s1528_s26 = scalar_lea.vmem %s1527_s25, 1024 }
  0x1b   : > { %v331_v15 = vrot.slane %v317_v11, %v1668_v6  ;;  %v262_v20 = vcombine.high %v1406_v16, %v1406_v16  ;;  %v267_v21 = vsel %vm206_vm0, %v1406_v16, 0  ;;  %v412_v23 = vrot.slane %v398_v13, %v1668_v6  ;;  %v1440_v33 = vld [vmem:[%s1673_s28 + $0x6] sm:$0x3f]  ;;  %v1453_v39 = vld [vmem:[%s1673_s28 + $0xc] sm:$0x3f] }
  0x1c   : > { %414 = vrot.lane.b32.xlu1 %v405_v9, %s1586_s29  ;;  %333 = vrot.lane.b32.xlu0 %v324_v10, %s1586_s29  ;;  %v332_v14 = vcombine.high %v324_v10, %v324_v10  ;;  %v413_v22 = vcombine.high %v405_v9, %v405_v9  ;;  %v642_v24 = vrot.slane %v1427_v17, %v1668_v6  ;;  %v1419_v47 = vld.sshfl [vmem:[%s1673_s28 + $0xc] sm:$0x33 pattern:$0x76325410] }
  0x1d   : > { %1404 = vmatprep.subr.msk.bf16.mxu0 %vm206_vm0, %v1685_v18  ;;  %1407 = vmatprep.subr.msk.bf16.mxu1 %vm206_vm0, %v262_v20  ;;  %v649_v30 = vrot.slane %v635_v27, %v1668_v6  ;;  %v814_v31 = vrot.slane %v803_v29, %v1668_v6  ;;  %v807_v32 = vcombine.high %v803_v29, %v803_v29  ;;  %v493_v57 = vsel %vm206_vm0, %v1419_v47, 0  ;;  %v1424_v10 = vld [vmem:[%s1950_s1 + $0xc] sm:$0x3]  ;;  %v1441_v27 = vld [vmem:[%s1950_s1 + $0x16] sm:$0x3] }
  0x1e   : > { %228 = vmatpush1.bf16.msra.mxu0 %v1688_v19  ;;  %287 = vmatpush1.bf16.msra.mxu1 %v267_v21  ;;  %v650_v28 = vcombine.high %v642_v24, %v642_v24  ;;  %v895_v36 = vrot.slane %v1440_v33, %v1668_v6  ;;  %v888_v37 = vcombine.high %v1440_v33, %v1440_v33  ;;  %v1431_v21 = vld [vmem:[%s1950_s1 + $0x10] sm:$0x3]  ;;  %v1445_v29 = vld [vmem:[%s1950_s1 + $0x1a] sm:$0x3]  ;;  %v1450_v33 = vld [vmem:[%s1950_s1 + $0x1c] sm:$0x3] }
  0x1f   : > { %v822_v34 = vcombine.high %v814_v31, %v814_v31  ;;  %v821_v35 = vrot.slane %v807_v32, %v1668_v6  ;;  %v1115_v41 = vrot.slane %v1453_v39, %v1668_v6  ;;  %v1108_v42 = vcombine.high %v1453_v39, %v1453_v39 }
  0x20   : > { %335 = vrot.lane.b32.xlu0 %v332_v14, %s1586_s29  ;;  %337 = vrot.lane.b32.xlu1 %v331_v15, %s1586_s29  ;;  %v903_v38 = vcombine.high %v895_v36, %v895_v36  ;;  %v902_v40 = vrot.slane %v888_v37, %v1668_v6  ;;  %v488_v50 = vcombine.high %v1419_v47, %v1419_v47  ;;  %v1428_v14 = vld [vmem:[%s1950_s1 + $0xe] sm:$0x3] }
  0x21   : > { %1405 = vmatmul.mubr.msk.bf16.vlgmr.msra.gmra.mxu0 %vm202_vm1, %v1402_v25  ;;  %1408 = vmatmul.mubr.msk.bf16.vlgmr.msra.gmra.mxu1 %vm202_vm1, %v188_v26  ;;  %v1123_v43 = vcombine.high %v1115_v41, %v1115_v41  ;;  %v1122_v44 = vrot.slane %v1108_v42, %v1668_v6  ;;  %v1416_v6 = vld [vmem:[%s1950_s1 + $0x8] sm:$0x3] }
  0x22   : > { %383 = vmatprep.mubr.bf16.mxu0 %v1585_v3  ;;  %463 = vmatprep.mubr.bf16.mxu1 %v1585_v3 }
  0x24   : > { %416 = vrot.lane.b32.xlu0 %v413_v22, %s1586_s29  ;;  %418 = vrot.lane.b32.xlu1 %v412_v23, %s1586_s29 }
  0x28   : > { %651 = vrot.lane.b32.xlu0 %v642_v24, %s1586_s29  ;;  %653 = vrot.lane.b32.xlu1 %v650_v28, %s1586_s29  ;;  %v1437_v24 = vld [vmem:[%s1950_s1 + $0x14] sm:$0x3] }
  0x2c   : > { %655 = vrot.lane.b32.xlu0 %v649_v30, %s1586_s29  ;;  %823 = vrot.lane.b32.xlu1 %v814_v31, %s1587_s7  ;;  %v1444_v31 = vld [vmem:[%s1950_s1 + $0x18] sm:$0x3]  ;;  %s1400_s29 = sshll.u32 %s1663_s24, 2  ;;  %s1465_s24 = sshll.u32 %s1632_s16, 9 }
  0x2d   : > { %s185_s5 = scalar_lea.vmem %s1951_s2, %s1400_s29  ;;  %s1903_s17 = scalar_lea.hbm %s1952_s3, %s1465_s24 }
  0x2e   : > { %s1909_s16 = scalar_lea.sflag [#allocation3], %s174_s6 }
  0x30   : > { %825 = vrot.lane.b32.xlu0 %v822_v34, %s1587_s7  ;;  %827 = vrot.lane.b32.xlu1 %v821_v35, %s1587_s7  ;;  %v1454_v34 = vld [vmem:[%s1950_s1 + $0x1e] sm:$0x3] }
  0x34   : > { %904 = vrot.lane.b32.xlu0 %v895_v36, %s1587_s7  ;;  %906 = vrot.lane.b32.xlu1 %v903_v38, %s1587_s7 }
  0x38   : > { %908 = vrot.lane.b32.xlu0 %v902_v40, %s1587_s7  ;;  %1124 = vrot.lane.b32.xlu1 %v1115_v41, %s1587_s7 }
  0x3c   : > { %1126 = vrot.lane.b32.xlu0 %v1123_v43, %s1587_s7  ;;  %1128 = vrot.lane.b32.xlu1 %v1122_v44, %s1587_s7  ;;  %s1398_s7 = sshll.u32 %s174_s6, 5 }
  0x3d   : > { %s176_s8 = scalar_lea.vmem [#allocation2], %s1398_s7 }
  0x3e   : > { %s1320_s9 = sshll.u32 %s176_s8, 4  ;;  %s1905_s9 = int_to_ptr.vmem [resolvable:$true] %s1320_s9 }
  0x3f   : > { %s1522_s19 = scalar_lea.vmem %s1905_s9, 512  ;;  %p1529_p0 = scmp.lt.s32.totalorder %s1905_s9, %s1527_s25 }
  0x40   : > { %p1523_p11 = scmp.ne.s32.totalorder %s1905_s9, %s1522_s19  ;;  %p1530_p1 = scmp.lt.s32.totalorder %s1528_s26, %s1522_s19 }
  0x42   : > { %p1524_p12 = pnand %p1523_p11, %p1649_p5  ;;  %p1531_p2 = por %p1530_p1, %p1529_p0 }
  0x44   : > { %p1525_p13 = pneg %p1524_p12 }
  0x46   : > { %p1532_p3 = pnand %p1531_p2, %p1525_p13 }
  0x8e   : > { %v415_v45 = vpop.permute.xlu1 %414  ;;  %v334_v46 = vpop.permute.xlu0 %333 }
  0x92   : > { %v336_v48 = vpop.permute.xlu0 %335  ;;  %v338_v49 = vpop.permute.xlu1 %337 }
  0x93   : > { %v340_v51 = vsel %vm339_vm2, %v334_v46, %v336_v48  ;;  %v341_v52 = vsel %vm339_vm2, %v336_v48, %v338_v49 }
  0x94   : > { %v346_v53 = vsel %vm206_vm0, %v340_v51, 0  ;;  %1410 = vmatprep.subr.msk.bf16.mxu0 %vm206_vm0, %v341_v52 }
  0x95   : > { %366 = vmatpush1.bf16.msra.mxu0 %v346_v53 }
  0x96   : > { %v417_v55 = vpop.permute.xlu0 %416  ;;  %v419_v56 = vpop.permute.xlu1 %418  ;;  %1420 = vmatprep.subr.msk.bf16.mxu0 %vm206_vm0, %v488_v50 }
  0x97   : > { %v420_v58 = vsel %vm339_vm2, %v415_v45, %v417_v55  ;;  %v1736_v59 = vsel %vm339_vm2, %v417_v55, %v419_v56 }
  0x98   : > { %v1739_v60 = vsel %vm206_vm0, %v420_v58, 0  ;;  %1411 = vmatmul.mubr.msk.bf16.vlgmr.msra.gmra.mxu0 %vm202_vm1, %v1409_v54  ;;  %1414 = vmatprep.subr.msk.bf16.mxu1 %vm206_vm0, %v1736_v59 }
  0x99   : > { %446 = vmatpush1.bf16.msra.mxu1 %v1739_v60  ;;  %513 = vmatpush1.bf16.msra.mxu0 %v493_v57 }
  0x9a   : > { %1425 = vmatprep.subr.msk.bf16.mxu0 %vm206_vm0, %v1736_v59  ;;  %v652_v62 = vpop.permute.xlu0 %651  ;;  %530 = vmatprep.mubr.bf16.mxu0 %v1585_v3  ;;  %v654_v63 = vpop.permute.xlu1 %653 }
  0x9b   : > { %1422 = vmatprep.subr.msk.bf16.mxu1 %vm206_vm0, %v1685_v18  ;;  %v657_v4 = vsel %vm339_vm2, %v652_v62, %v654_v63  ;;  %v1432_v18 = vld [vmem:[%s1950_s1 + $0x12] sm:$0x3] }
  0x9c   : > { %1415 = vmatmul.mubr.msk.bf16.vlgmr.msra.gmra.mxu1 %vm202_vm1, %v1413_v61  ;;  %v663_v7 = vsel %vm206_vm0, %v657_v4, 0 }
  0x9d   : > { %557 = vmatpush1.bf16.msra.mxu1 %v1688_v19  ;;  %574 = vmatprep.mubr.bf16.mxu1 %v1585_v3 }
  0x9e   : > { %v656_v1 = vpop.permute.xlu0 %655  ;;  %v824_v2 = vpop.permute.xlu1 %823 }
  0x9f   : > { %v658_v5 = vsel %vm339_vm2, %v654_v63, %v656_v1 }
  0xa0   : > { %1421 = vmatmul.mubr.msk.bf16.vlgmr.msra.gmra.mxu0 %vm202_vm1, %v1418_v0  ;;  %1429 = vmatprep.subr.msk.bf16.mxu1 %vm206_vm0, %v658_v5 }
  0xa1   : > { %603 = vmatpush1.bf16.msra.mxu0 %v1739_v60  ;;  %620 = vmatprep.mubr.bf16.mxu0 %v1585_v3 }
  0xa2   : > { %1433 = vmatprep.subr.msk.bf16.mxu0 %vm206_vm0, %v1736_v59  ;;  %v826_v8 = vpop.permute.xlu0 %825  ;;  %v828_v9 = vpop.permute.xlu1 %827 }
  0xa3   : > { %v831_v12 = vsel %vm829_vm3, %v826_v8, %v828_v9  ;;  %v830_v16 = vsel %vm829_vm3, %v824_v2, %v826_v8 }
  0xa4   : > { %1423 = vmatmul.mubr.msk.bf16.vlgmr.msra.gmra.mxu1 %vm202_vm1, %v1416_v6  ;;  %v836_v19 = vsel %vm206_vm0, %v830_v16, 0 }
  0xa5   : > { %683 = vmatpush1.bf16.msra.mxu1 %v663_v7  ;;  %700 = vmatprep.mubr.bf16.mxu1 %v1585_v3 }
  0xa6   : > { %1435 = vmatprep.subr.msk.bf16.mxu1 %vm206_vm0, %v341_v52  ;;  %v905_v11 = vpop.permute.xlu0 %904  ;;  %v907_v13 = vpop.permute.xlu1 %906 }
  0xa7   : > { %v910_v20 = vsel %vm829_vm3, %v905_v11, %v907_v13 }
  0xa8   : > { %1426 = vmatmul.mubr.msk.bf16.vlgmr.msra.gmra.mxu0 %vm202_vm1, %v1424_v10  ;;  %v916_v22 = vsel %vm206_vm0, %v910_v20, 0 }
  0xa9   : > { %733 = vmatpush1.bf16.msra.mxu0 %v1739_v60  ;;  %750 = vmatprep.mubr.bf16.mxu0 %v1585_v3 }
  0xaa   : > { %1438 = vmatprep.subr.msk.bf16.mxu0 %vm206_vm0, %v831_v12  ;;  %v909_v15 = vpop.permute.xlu0 %908  ;;  %v1125_v23 = vpop.permute.xlu1 %1124 }
  0xab   : > { %v911_v17 = vsel %vm829_vm3, %v907_v13, %v909_v15 }
  0xac   : > { %1430 = vmatmul.mubr.msk.bf16.vlgmr.msra.gmra.mxu1 %vm202_vm1, %v1428_v14 }
  0xad   : > { %777 = vmatpush1.bf16.msra.mxu1 %v346_v53  ;;  %794 = vmatprep.mubr.bf16.mxu1 %v1585_v3 }
  0xae   : > { %1442 = vmatprep.subr.msk.bf16.mxu1 %vm206_vm0, %v911_v17  ;;  %v1127_v25 = vpop.permute.xlu0 %1126  ;;  %v1129_v26 = vpop.permute.xlu1 %1128 }
  0xaf   : > { %v1131_v28 = vsel %vm829_vm3, %v1127_v25, %v1129_v26  ;;  %v1130_v30 = vsel %vm829_vm3, %v1125_v23, %v1127_v25 }
  0xb0   : > { %1434 = vmatmul.mubr.msk.bf16.vlgmr.msra.gmra.mxu0 %vm202_vm1, %v1432_v18  ;;  %v1136_v32 = vsel %vm206_vm0, %v1130_v30, 0 }
  0xb1   : > { %856 = vmatpush1.bf16.msra.mxu0 %v836_v19  ;;  %873 = vmatprep.mubr.bf16.mxu0 %v1585_v3 }
  0xb2   : > { %1446 = vmatprep.subr.msk.bf16.mxu0 %vm206_vm0, %v658_v5 }
  0xb4   : > { %1436 = vmatmul.mubr.msk.bf16.vlgmr.msra.gmra.mxu1 %vm202_vm1, %v1431_v21 }
  0xb5   : > { %936 = vmatpush1.bf16.msra.mxu1 %v916_v22  ;;  %953 = vmatprep.mubr.bf16.mxu1 %v1585_v3 }
  0xb6   : > { %1448 = vmatprep.subr.msk.bf16.mxu1 %vm206_vm0, %v1736_v59 }
  0xb8   : > { %1439 = vmatmul.mubr.msk.bf16.vlgmr.msra.gmra.mxu0 %vm202_vm1, %v1437_v24 }
  0xb9   : > { %986 = vmatpush1.bf16.msra.mxu0 %v663_v7  ;;  %1003 = vmatprep.mubr.bf16.mxu0 %v1585_v3 }
  0xba   : > { %1451 = vmatprep.subr.msk.bf16.mxu0 %vm206_vm0, %v911_v17 }
  0xbc   : > { %1443 = vmatmul.mubr.msk.bf16.vlgmr.msra.gmra.mxu1 %vm202_vm1, %v1441_v27 }
  0xbd   : > { %1030 = vmatpush1.bf16.msra.mxu1 %v1739_v60  ;;  %1047 = vmatprep.mubr.bf16.mxu1 %v1585_v3 }
  0xbe   : > { %1455 = vmatprep.subr.msk.bf16.mxu1 %vm206_vm0, %v1131_v28 }
  0xc0   : > { %1447 = vmatmul.mubr.msk.bf16.vlgmr.msra.gmra.mxu0 %vm202_vm1, %v1445_v29 }
  0xc1   : > { %1076 = vmatpush1.bf16.msra.mxu0 %v916_v22  ;;  %1093 = vmatprep.mubr.bf16.mxu0 %v1585_v3 }
  0xc4   : > { %1449 = vmatmul.mubr.msk.bf16.vlgmr.msra.gmra.mxu1 %vm202_vm1, %v1444_v31 }
  0xc5   : > { %1156 = vmatpush1.bf16.msra.mxu1 %v1136_v32  ;;  %1173 = vmatprep.mubr.bf16.mxu1 %v1585_v3 }
  0xc8   : > { %1452 = vmatmul.mubr.msk.bf16.vlgmr.msra.gmra.mxu0 %vm202_vm1, %v1450_v33 }
  0xcc   : > { %1456 = vmatmul.mubr.msk.bf16.vlgmr.msra.gmra.mxu1 %vm202_vm1, %v1454_v34 }
  0xe1   : > { %v247_v35 = vpop.f32.mrf.mxu0  ;;  %v306_v36 = vpop.f32.mrf.mxu1 }
  0xe2   : > { %v307_v37 = vadd.f32 %v306_v36, %v247_v35 }
  0xe3   : > { %v249_v38 = vpop.f32.mrf.mxu0  ;;  %v308_v39 = vpop.f32.mrf.mxu1 }
  0xe4   : > { %v309_v40 = vadd.f32 %v308_v39, %v249_v38 }
  0xe5   : > { %v251_v41 = vpop.f32.mrf.mxu0  ;;  %v310_v42 = vpop.f32.mrf.mxu1 }
  0xe7   : > { %v252_v43 = vpop.f32.mrf.mxu0  ;;  %v311_v44 = vpop.f32.mrf.mxu1 }
 0x158   : > { %v385_v45 = vpop.f32.mrf.mxu0 }
 0x159   : > { %v392_v46 = vadd.f32 %v385_v45, %v307_v37 }
 0x15a   : > { %v387_v3 = vpop.f32.mrf.mxu0 }
 0x15b   : > { %v393_v49 = vadd.f32 %v387_v3, %v309_v40 }
 0x15c   : > { %v389_v47 = vpop.f32.mrf.mxu0  ;;  %v465_v48 = vpop.f32.mrf.mxu1 }
 0x15d   : > { %v1840_v50 = vadd.f32 %v465_v48, %v392_v46 }
 0x15e   : > { %v390_v51 = vpop.f32.mrf.mxu0  ;;  %v467_v52 = vpop.f32.mrf.mxu1 }
 0x15f   : > { %v1842_v53 = vadd.f32 %v467_v52, %v393_v49  ;;  %v1185_v56 = vsel %vm1184_vm4, %v1840_v50, 0.0  ;;  %v1190_v58 = vmul.f32 %v1840_v50, %v1840_v50 }
 0x160   : > { %v469_v54 = vpop.f32.mrf.mxu1  ;;  %v532_v55 = vpop.f32.mrf.mxu0 }
 0x161   : > { %v1186_v57 = vsel %vm1184_vm4, %v1842_v53, 0.0  ;;  %v1191_v59 = vmul.f32 %v1842_v53, %v1842_v53  ;;  %v1192_v2 = vsel %vm1184_vm4, %v1190_v58, 0.0 }
 0x162   : > { %v470_v60 = vpop.f32.mrf.mxu1  ;;  %v534_v61 = vpop.f32.mrf.mxu0  ;;  %v1187_v62 = vadd.f32 %v1186_v57, %v1185_v56 }
 0x163   : > { %v1193_v63 = vsel %vm1184_vm4, %v1191_v59, 0.0 }
 0x164   : > { %v536_v0 = vpop.f32.mrf.mxu0  ;;  %v576_v1 = vpop.f32.mrf.mxu1  ;;  %1188 = vadd.xlane.f32.xlu0 %v1187_v62  ;;  %v1194_v6 = vadd.f32 %v1193_v63, %v1192_v2 }
 0x165   : > { %v577_v9 = vadd.f32 %v576_v1, %v532_v55 }
 0x166   : > { %v537_v4 = vpop.f32.mrf.mxu0  ;;  %v578_v5 = vpop.f32.mrf.mxu1 }
 0x167   : > { %v579_v12 = vadd.f32 %v578_v5, %v534_v61 }
 0x168   : > { %v580_v7 = vpop.f32.mrf.mxu1  ;;  %v622_v8 = vpop.f32.mrf.mxu0  ;;  %1195 = vadd.xlane.f32.xlu0 %v1194_v6 }
 0x169   : > { %v629_v13 = vadd.f32 %v622_v8, %v577_v9 }
 0x16a   : > { %v581_v10 = vpop.f32.mrf.mxu1  ;;  %v624_v11 = vpop.f32.mrf.mxu0 }
 0x16b   : > { %v630_v16 = vadd.f32 %v624_v11, %v579_v12 }
 0x16c   : > { %v626_v14 = vpop.f32.mrf.mxu0  ;;  %v702_v15 = vpop.f32.mrf.mxu1 }
 0x16d   : > { %v1854_v17 = vadd.f32 %v702_v15, %v629_v13 }
 0x16e   : > { %v627_v18 = vpop.f32.mrf.mxu0  ;;  %v704_v19 = vpop.f32.mrf.mxu1 }
 0x16f   : > { %v1856_v20 = vadd.f32 %v704_v19, %v630_v16  ;;  %v1203_v21 = vmul.f32 %v1854_v17, %v1854_v17  ;;  %v1197_v24 = vsel %vm1184_vm4, %v1854_v17, 0.0 }
 0x170   : > { %v706_v22 = vpop.f32.mrf.mxu1  ;;  %v752_v23 = vpop.f32.mrf.mxu0 }
 0x171   : > { %v1198_v25 = vsel %vm1184_vm4, %v1856_v20, 0.0  ;;  %v1204_v26 = vmul.f32 %v1856_v20, %v1856_v20  ;;  %v1205_v30 = vsel %vm1184_vm4, %v1203_v21, 0.0 }
 0x172   : > { %v707_v27 = vpop.f32.mrf.mxu1  ;;  %v754_v28 = vpop.f32.mrf.mxu0  ;;  %v1199_v29 = vadd.f32 %v1198_v25, %v1197_v24 }
 0x173   : > { %v1206_v31 = vsel %vm1184_vm4, %v1204_v26, 0.0 }
 0x174   : > { %v756_v32 = vpop.f32.mrf.mxu0  ;;  %v796_v33 = vpop.f32.mrf.mxu1  ;;  %1200 = vadd.xlane.f32.xlu1 %v1199_v29  ;;  %v1207_v34 = vadd.f32 %v1206_v31, %v1205_v30 }
 0x175   : > { %v797_v39 = vadd.f32 %v796_v33, %v752_v23 }
 0x176   : > { %v757_v35 = vpop.f32.mrf.mxu0  ;;  %v798_v36 = vpop.f32.mrf.mxu1  ;;  %1208 = vadd.xlane.f32.xlu0 %v1207_v34 }
 0x177   : > { %v799_v42 = vadd.f32 %v798_v36, %v754_v28 }
 0x178   : > { %v800_v37 = vpop.f32.mrf.mxu1  ;;  %v875_v38 = vpop.f32.mrf.mxu0 }
 0x179   : > { %v882_v43 = vadd.f32 %v875_v38, %v797_v39 }
 0x17a   : > { %v801_v40 = vpop.f32.mrf.mxu1  ;;  %v877_v41 = vpop.f32.mrf.mxu0 }
 0x17b   : > { %v883_v3 = vadd.f32 %v877_v41, %v799_v42 }
 0x17c   : > { %v879_v44 = vpop.f32.mrf.mxu0  ;;  %v955_v45 = vpop.f32.mrf.mxu1 }
 0x17d   : > { %v1868_v46 = vadd.f32 %v955_v45, %v882_v43 }
 0x17e   : > { %v880_v47 = vpop.f32.mrf.mxu0  ;;  %v957_v48 = vpop.f32.mrf.mxu1 }
 0x17f   : > { %v1870_v49 = vadd.f32 %v957_v48, %v883_v3  ;;  %v1217_v51 = vmul.f32 %v1868_v46, %v1868_v46  ;;  %v1211_v55 = vsel %vm1184_vm4, %v1868_v46, 0.0 }
 0x180   : > { %v959_v52 = vpop.f32.mrf.mxu1  ;;  %v1005_v54 = vpop.f32.mrf.mxu0 }
 0x181   : > { %v1212_v56 = vsel %vm1184_vm4, %v1870_v49, 0.0  ;;  %v1218_v57 = vmul.f32 %v1870_v49, %v1870_v49  ;;  %v1219_v61 = vsel %vm1184_vm4, %v1217_v51, 0.0 }
 0x182   : > { %v960_v58 = vpop.f32.mrf.mxu1  ;;  %v1007_v59 = vpop.f32.mrf.mxu0  ;;  %v1213_v60 = vadd.f32 %v1212_v56, %v1211_v55 }
 0x183   : > { %v1220_v62 = vsel %vm1184_vm4, %v1218_v57, 0.0 }
 0x184   : > { %v1009_v63 = vpop.f32.mrf.mxu0  ;;  %v1049_v0 = vpop.f32.mrf.mxu1  ;;  %1214 = vadd.xlane.f32.xlu1 %v1213_v60  ;;  %v1221_v1 = vadd.f32 %v1220_v62, %v1219_v61 }
 0x185   : > { %v1050_v7 = vadd.f32 %v1049_v0, %v1005_v54  ;;  %v1246_v54 = vld [vmem:[%s185_s5] sm:$0xf] }
 0x186   : > { %v1010_v2 = vpop.f32.mrf.mxu0  ;;  %v1051_v4 = vpop.f32.mrf.mxu1  ;;  %1222 = vadd.xlane.f32.xlu0 %v1221_v1 }
 0x187   : > { %v1052_v10 = vadd.f32 %v1051_v4, %v1007_v59 }
 0x188   : > { %v1053_v5 = vpop.f32.mrf.mxu1  ;;  %v1095_v6 = vpop.f32.mrf.mxu0 }
 0x189   : > { %v1102_v11 = vadd.f32 %v1095_v6, %v1050_v7 }
 0x18a   : > { %v1054_v8 = vpop.f32.mrf.mxu1  ;;  %v1097_v9 = vpop.f32.mrf.mxu0 }
 0x18b   : > { %v1103_v14 = vadd.f32 %v1097_v9, %v1052_v10 }
 0x18c   : > { %v1175_v12 = vpop.f32.mrf.mxu1  ;;  %v1099_v13 = vpop.f32.mrf.mxu0 }
 0x18d   : > { %v1182_v15 = vadd.f32 %v1175_v12, %v1102_v11 }
 0x18e   : > { %v1177_v16 = vpop.f32.mrf.mxu1  ;;  %v1100_v18 = vpop.f32.mrf.mxu0 }
 0x18f   : > { %v1183_v19 = vadd.f32 %v1177_v16, %v1103_v14  ;;  %v1231_v21 = vmul.f32 %v1182_v15, %v1182_v15  ;;  %v1225_v23 = vsel %vm1184_vm4, %v1182_v15, 0.0 }
 0x190   : > { %v1179_v22 = vpop.f32.mrf.mxu1 }
 0x191   : > { %v1226_v24 = vsel %vm1184_vm4, %v1183_v19, 0.0  ;;  %v1232_v25 = vmul.f32 %v1183_v19, %v1183_v19  ;;  %v1233_v28 = vsel %vm1184_vm4, %v1231_v21, 0.0 }
 0x192   : > { %v1180_v26 = vpop.f32.mrf.mxu1  ;;  %v1227_v27 = vadd.f32 %v1226_v24, %v1225_v23 }
 0x193   : > { %v1234_v29 = vsel %vm1184_vm4, %v1232_v25, 0.0 }
 0x194   : > { %1228 = vadd.xlane.f32.xlu1 %v1227_v27  ;;  %v1235_v30 = vadd.f32 %v1234_v29, %v1233_v28 }
 0x196   : > { %1236 = vadd.xlane.f32.xlu0 %v1235_v30 }
 0x1ed   : > { %v1189_v31 = vpop.xlane.xlu0 %1188 }
 0x1f1   : > { %v1196_v32 = vpop.xlane.xlu0 %1195 }
 0x1fd   : > { %v1201_v33 = vpop.xlane.xlu1 %1200 }
 0x1fe   : > { %v1202_v36 = vadd.f32 %v1201_v33, %v1189_v31 }
 0x1ff   : > { %v1209_v34 = vpop.xlane.xlu0 %1208 }
 0x200   : > { %v1210_v38 = vadd.f32 %v1209_v34, %v1196_v32 }
 0x20d   : > { %v1215_v35 = vpop.xlane.xlu1 %1214 }
 0x20e   : > { %v1216_v39 = vadd.f32 %v1215_v35, %v1202_v36 }
 0x20f   : > { %v1223_v37 = vpop.xlane.xlu0 %1222 }
 0x210   : > { %v1224_v41 = vadd.f32 %v1223_v37, %v1210_v38 }
 0x21d   : > { %v1229_v40 = vpop.xlane.xlu1 %1228 }
 0x21e   : > { %v1230_v42 = vadd.f32 %v1229_v40, %v1216_v39 }
 0x21f   : > { %v1237_v43 = vpop.xlane.xlu0 %1236 }
 0x220   : > { %v1239_v44 = vmul.f32 0.0009765625, %v1230_v42  ;;  %v1238_v45 = vadd.f32 %v1237_v43, %v1224_v41 }
 0x222   : > { %v1241_v3 = vmul.f32 %v1239_v44, %v1239_v44  ;;  %v1240_v47 = vmul.f32 0.0009765625, %v1238_v45 }
 0x224   : > { %v1242_v48 = vsub.f32 %v1240_v47, %v1241_v3 }
 0x226   : > { %v1243_v51 = vmax.f32 %v1242_v48, 0.0 }
 0x228   : > { %v1244_v52 = vadd.f32 1e-05, %v1243_v51 }
 0x22a   : > { %1520 = vrsqrt.f32 %v1244_v52 }
 0x237   : > { %v1521_v55 = vpop.eup %1520 }
 0x238   : > { %v1247_v56 = vmul.f32 %v1521_v55, %v1246_v54 }
 0x23a   : > { %1251 = vperm.xlu1 %1512, %v1247_v56   ;;  %v1248_v57 = vmul.f32 %v1247_v56, %v1239_v44 }
 0x23c   : > { %1258 = vperm.xlu0 %1513, %v1248_v57  }
 0x2b5   : > { %v1252_v58 = vpop.permute.xlu1 %1251 }
 0x2b6   : > { %v1254_v59 = vmul.f32 %v1252_v58, %v1840_v50  ;;  %v1255_v60 = vmul.f32 %v1252_v58, %v1842_v53  ;;  %v1270_v61 = vmul.f32 %v1252_v58, %v1854_v17  ;;  %v1271_v62 = vmul.f32 %v1252_v58, %v1856_v20 }
 0x2b7   : > { %v1282_v63 = vmul.f32 %v1252_v58, %v1868_v46  ;;  %v1283_v0 = vmul.f32 %v1252_v58, %v1870_v49  ;;  %v1294_v1 = vmul.f32 %v1252_v58, %v1182_v15  ;;  %v1295_v2 = vmul.f32 %v1252_v58, %v1183_v19  ;;  %v1259_v4 = vpop.permute.xlu0 %1258 }
 0x2b8   : > { %v1261_v5 = vsub.f32 %v1254_v59, %v1259_v4  ;;  %v1262_v6 = vsub.f32 %v1255_v60, %v1259_v4  ;;  %v1272_v7 = vsub.f32 %v1270_v61, %v1259_v4  ;;  %v1273_v8 = vsub.f32 %v1271_v62, %v1259_v4 }
 0x2b9   : > { %v1284_v9 = vsub.f32 %v1282_v63, %v1259_v4  ;;  %v1285_v50 = vsub.f32 %v1283_v0, %v1259_v4  ;;  %v1296_v10 = vsub.f32 %v1294_v1, %v1259_v4  ;;  %v1297_v53 = vsub.f32 %v1295_v2, %v1259_v4 }
 0x2ba   : > { %v1263_v17 = vmax.f32 %v1261_v5, 0.0  ;;  %v1264_v20 = vmax.f32 %v1262_v6, 0.0  ;;  %v1274_v11 = vmax.f32 %v1272_v7, 0.0  ;;  %v1275_v46 = vmax.f32 %v1273_v8, 0.0 }
 0x2bb   : > { %v1286_v49 = vmax.f32 %v1284_v9, 0.0  ;;  %v1287_v12 = vmax.f32 %v1285_v50, 0.0  ;;  %v1298_v13 = vmax.f32 %v1296_v10, 0.0  ;;  %v1299_v14 = vmax.f32 %v1297_v53, 0.0 }
 0x2bc   : > { %v1267_v15 = vcombine.low %v1263_v17, %v1264_v20  ;;  %v1278_v16 = vcombine.low %v1274_v11, %v1275_v46 }
 0x2bd   : > { %v1290_v18 = vcombine.low %v1286_v49, %v1287_v12  ;;  %v1302_v19 = vcombine.low %v1298_v13, %v1299_v14 }
 0x2be   : > { %1269 = vst [vmem:[%s176_s8] sm:$0xff] %v1267_v15  ;;  %1457 = vst [vmem:[%s176_s8 + $0x8] sm:$0xff] %v1278_v16 }
 0x2bf   : > { %1458 = vst [vmem:[%s176_s8 + $0x10] sm:$0xff] %v1290_v18  ;;  %1459 = vst [vmem:[%s176_s8 + $0x18] sm:$0xff] %v1302_v19 }
 0x2c0   : > { %1535 = shalt.err (!%p1532_p3)
}
 0x2c1   : > { %s1536_s27 = scalar_lea.hbm %s1903_s17, 512  ;;  %s1540_s30 = scalar_lea.hbm %s1952_s3, 1024 }
 0x2c2   : > { %p1537_p4 = scmp.ne.s32.totalorder %s1903_s17, %s1536_s27  ;;  %p1541_p9 = scmp.lt.s32.totalorder %s1903_s17, %s1952_s3 }
 0x2c3   : > { %p1542_p10 = scmp.lt.s32.totalorder %s1540_s30, %s1536_s27 }
 0x2c4   : > { %p1538_p7 = pnand %p1537_p4, %p1649_p5 }
 0x2c5   : > { %p1543_p11 = por %p1542_p10, %p1541_p9 }
 0x2c6   : > { %p1539_p8 = pneg %p1538_p7 }
 0x2c8   : > { %p1544_p12 = pnand %p1543_p11, %p1539_p8 }
 0x2ca   : > { %1547 = shalt.err (!%p1544_p12)
}
 0x2cb   : > { %s1589_s6 = smov 128   ;;  %s1590_s7 = smov 8  }
 0x2cc   : > { %1467 = dma.vmem_to_hbm [thread:$0]  (%p1649_p5), %s1905_s9, 512, %s1903_s17, %s1909_s16, %s1589_s6, %s1589_s6, %s1590_s7  }
 0x2cd PF: > { %p1473_p13 = scmp.ge.s32.totalorder %s1582_s15, 2  ;;  %s1335_s24 = sand.u32 1, %s1570_s12  }
 0x2ce   : > { %s1336_s8 = scalar_lea.sflag [#allocation3], %s1335_s24 }
 0x2cf   : > { %p1470_p0 = pnand %p1473_p13, %p1653_p6 }
 0x2d1   : > { %p1471_p1 = pneg %p1470_p0 }
 0x2d3   : > { %1565 = dma.done.wait (%p1471_p1), %s1336_s8, 512  }
 0x2d4   : > { %1567 = vsyncadd (%p1471_p1), %s1336_s8, 4294966784  ;;  %p13_p2 = scmp.ge.s32.totalorder %s1636_s18, 4   ;;  %s1955_s12 = smov %s1574_s13 }
 0x2d5   : > { %s1956_s13 = smov %s1578_s14  ;;  %s1957_s14 = smov %s1647_s21 }
 0x2d6   : > { %s1958_s15 = smov %s1636_s18  ;;  %15 = sbr.rel (!%p13_p2) target bundleno = 3 (0x3), region = 90 }
 0x2db   :  { %1341 = vsyncpa [#allocation3], 1 }
 0x2dc   :  { %1343 = vsyncpa [#allocation3 + $0x1], 1 }

</bundles_post_ra>
